<compile_context>
chip_gen: v5e
topology: v5e:2x2
jax: 0.10.0
libtpu: 0.0.40
codegen_flags: <defaults>
</compile_context>

<pallas_src>
import functools

import jax
import jax.numpy as jnp
import numpy as np
from jax.experimental import pallas as pl
from jax.experimental.pallas import tpu as pltpu

_MIB = 1024 * 1024


# ---------------------------------------------------------------------------
# VMEM budgeting / tile selection
# ---------------------------------------------------------------------------
def _vmem_budget_bytes():
    """Scoped-VMEM budget to request, derived from the chip's physical VMEM."""
    try:
        phys = int(pltpu.get_tpu_info().vmem_capacity_bytes)
    except Exception:  # conservative fallback (v7x-sized VMEM)
        phys = 64 * _MIB
    # ~96 MiB on v5e/v6e (128 MiB physical), ~48 MiB on v7x (64 MiB physical).
    return int(min(100 * _MIB, phys * 3 // 4))


def _row_candidates(row_multiple):
    # bf16 packs 16 rows per packed vreg -> multiples of 16; f32 -> multiples of 8.
    return [c for c in (2048, 1024, 512, 256, 128, 64, 32, 16, 8)
            if c % row_multiple == 0]


def _pick_full_weight_bm(rows, dim, x_isz, w_isz, mm_isz, budget, row_multiple):
    """Largest row block whose FULL footprint fits the VMEM budget (resident weight path)."""
    def footprint(bm):
        return (4 * bm * dim * x_isz          # x + out tiles, double buffered
                + dim * dim * w_isz           # resident (D, D) weight (single buffer)
                + 4 * dim * 4                 # gamma / beta / bias
                + 3 * bm * dim * 4            # f32 LayerNorm temporaries (margin)
                + bm * dim * mm_isz)          # normed matmul operand

    cands = [c for c in _row_candidates(row_multiple) if c <= rows] or [rows]
    fitting = [c for c in cands if footprint(c) <= budget]
    if not fitting:
        return None
    # Prefer >= 2 grid steps so a v7x megacore can shard the "parallel" axis.
    multi = [c for c in fitting if pl.cdiv(rows, c) >= 2]
    return multi[0] if multi else fitting[0]


def _pick_ntiled(rows, dim, x_isz, w_isz, mm_isz, budget, row_multiple, tn_override=None):
    """(bm, tn) for the N-tiled path (weight streamed in (D, tn) slabs)."""
    if tn_override is not None:
        tns = [tn_override] if dim % tn_override == 0 else []
    else:
        tns = [t for t in (1024, 512, 256, 128) if dim % t == 0]
    if not tns:
        return None
    cands = [c for c in _row_candidates(row_multiple) if c <= rows] or [rows]

    def footprint(bm, tn):
        return (2 * bm * dim * x_isz          # x (full rows, for LayerNorm), dbl buffered
                + 2 * bm * tn * x_isz         # x residual tile, double buffered
                + 2 * bm * tn * x_isz         # out tile, double buffered
                + 2 * dim * tn * w_isz        # weight slab, double buffered
                + bm * dim * mm_isz           # resident normed scratch
                + 4 * dim * 4                 # gamma / beta / bias
                + 3 * bm * dim * 4)           # f32 LayerNorm temporaries (margin)

    # Bigger bm => fewer re-streams of the full weight; sweep bm in the outer loop.
    for bm in cands:
        for tn in tns:
            if footprint(bm, tn) <= budget:
                return bm, tn
    return None


def _resident_spec(shape, index_map, single_buffer):
    """BlockSpec for a block whose index never changes; single-buffer it if possible."""
    if single_buffer:
        try:
            return pl.BlockSpec(shape, index_map, pipeline_mode=pl.Buffered(1))
        except (TypeError, AttributeError):
            pass
    return pl.BlockSpec(shape, index_map)


# ---------------------------------------------------------------------------
# Kernels
# ---------------------------------------------------------------------------
def _fused_prenorm_linear_kernel(x_ref, g_ref, b_ref, w_ref, wb_ref, o_ref, *,
                                 eps, matmul_dtype):
    # x_ref : (bm, D) rows (residual source), g/b: (1, D), w: (D, D) (in,out), wb: (1, D)
    xf = x_ref[...].astype(jnp.float32)
    mean = jnp.mean(xf, axis=-1, keepdims=True)
    xc = xf - mean
    var = jnp.mean(xc * xc, axis=-1, keepdims=True)
    normed = xc * jax.lax.rsqrt(var + eps)
    normed = normed * g_ref[...].astype(jnp.float32) + b_ref[...].astype(jnp.float32)

    # MXU matmul in matmul_dtype (weight cast once outside the kernel), f32 accumulation.
    y = jnp.dot(normed.astype(matmul_dtype), w_ref[...],
                preferred_element_type=jnp.float32)
    y = y + wb_ref[...].astype(jnp.float32)

    # Re-read x from its VMEM tile for the residual so the f32 upcast is not
    # held live across the MXU op (lower vreg pressure / spill risk at big bm).
    o_ref[...] = (y + x_ref[...].astype(jnp.float32)).astype(o_ref.dtype)


def _fused_prenorm_linear_ntiled_kernel(xfull_ref, xres_ref, g_ref, b_ref, w_ref,
                                        wb_ref, o_ref, normed_ref, *, eps):
    # Grid = (row blocks, N tiles).  LayerNorm is computed once per row block
    # (j == 0) into the resident `normed_ref` scratch and reused for every N tile.
    @pl.when(pl.program_id(1) == 0)
    def _():
        xf = xfull_ref[...].astype(jnp.float32)
        mean = jnp.mean(xf, axis=-1, keepdims=True)
        xc = xf - mean
        var = jnp.mean(xc * xc, axis=-1, keepdims=True)
        normed = xc * jax.lax.rsqrt(var + eps)
        normed = normed * g_ref[...].astype(jnp.float32) + b_ref[...].astype(jnp.float32)
        normed_ref[...] = normed.astype(normed_ref.dtype)

    y = jnp.dot(normed_ref[...], w_ref[...], preferred_element_type=jnp.float32)
    y = y + wb_ref[...].astype(jnp.float32)
    o_ref[...] = (y + xres_ref[...].astype(jnp.float32)).astype(o_ref.dtype)


def _layernorm_kernel(x_ref, g_ref, b_ref, o_ref, *, eps):
    xf = x_ref[...].astype(jnp.float32)
    mean = jnp.mean(xf, axis=-1, keepdims=True)
    xc = xf - mean
    var = jnp.mean(xc * xc, axis=-1, keepdims=True)
    y = xc * jax.lax.rsqrt(var + eps)
    y = y * g_ref[...].astype(jnp.float32) + b_ref[...].astype(jnp.float32)
    o_ref[...] = y.astype(o_ref.dtype)


def _residual_add_kernel(y_ref, x_ref, o_ref):
    o_ref[...] = y_ref[...] + x_ref[...]


# ---------------------------------------------------------------------------
# Wrappers
# ---------------------------------------------------------------------------
def pre_norm_residual_linear(x, gamma, beta, w, b, eps=1e-5, matmul_dtype=None,
                             force_path=None, tile_n=None):
    """Fused PreNormResidual with fn = Linear(dim, dim): Linear(LayerNorm(x)) + x.

    `w` is expected in (dim_in, dim_out) layout (transpose a PyTorch
    nn.Linear.weight once, outside the kernel).  `matmul_dtype` optionally
    casts the MXU operands (e.g. jnp.bfloat16 for f32 inputs on v6e); the
    LayerNorm statistics, bias add, residual and accumulation stay in f32.
    """
    orig_shape = x.shape
    D = int(orig_shape[-1])
    if w.shape != (D, D):
        raise ValueError("residual requires fn: dim -> dim (w must be (D, D), (in,out) layout)")
    R = int(np.prod(orig_shape[:-1]))

    matmul_dtype = np.dtype(x.dtype if matmul_dtype is None else matmul_dtype)
    w = w.astype(matmul_dtype)                      # cast once, outside the kernel
    x_isz = x.dtype.itemsize
    w_isz = matmul_dtype.itemsize

    budget = _vmem_budget_bytes()
    row_multiple = 16 if x.dtype == jnp.bfloat16 else 8

    bm_full = _pick_full_weight_bm(R, D, x_isz, w_isz, w_isz, budget, row_multiple)
    plan_nt = None
    if force_path == "ntiled" or (force_path is None and D >= 256 and D % 128 == 0):
        plan_nt = _pick_ntiled(R, D, x_isz, w_isz, w_isz, budget, row_multiple, tile_n)

    if force_path == "ntiled":
        if plan_nt is None:
            raise ValueError("N-tiled path unavailable for this shape")
        use_ntiled = True
    elif force_path == "full":
        use_ntiled = False
        if bm_full is None:
            bm_full = min(R, row_multiple)
    elif bm_full is not None and (plan_nt is None or bm_full >= 128 or bm_full >= plan_nt[0]):
        use_ntiled = False
    elif plan_nt is not None:
        use_ntiled = True
    else:
        # TODO(synk): huge D that is not a multiple of 128 cannot be N-tiled
        # cleanly; best-effort full path (may exceed the VMEM budget for such D).
        use_ntiled = False
        bm_full = min(R, row_multiple)

    bm = plan_nt[0] if use_ntiled else bm_full
    Rp = pl.cdiv(R, bm) * bm
    x2 = x.reshape(R, D)
    if Rp != R:
        x2 = jnp.pad(x2, ((0, Rp - R), (0, 0)))     # zero rows: finite LayerNorm, rows discarded
    g2 = gamma.reshape(1, D)
    be2 = beta.reshape(1, D)
    b2 = b.reshape(1, D)

    def _run(single_buffer):
        if use_ntiled:
            _, tn = plan_nt
            grid = (Rp // bm, D // tn)
            cost = pl.CostEstimate(
                flops=2 * Rp * D * D + 10 * Rp * D,
                transcendentals=Rp,
                bytes_accessed=2 * Rp * D * x_isz + (Rp // bm) * D * D * w_isz + 3 * D * 4,
            )
            return pl.pallas_call(
                functools.partial(_fused_prenorm_linear_ntiled_kernel, eps=float(eps)),
                grid=grid,
                in_specs=[
                    pl.BlockSpec((bm, D), lambda i, j: (i, 0)),                   # x (full rows, LayerNorm)
                    pl.BlockSpec((bm, tn), lambda i, j: (i, j)),                  # x residual tile
                    _resident_spec((1, D), lambda i, j: (0, 0), single_buffer),   # gamma
                    _resident_spec((1, D), lambda i, j: (0, 0), single_buffer),   # beta
                    pl.BlockSpec((D, tn), lambda i, j: (0, j)),                   # weight slab
                    pl.BlockSpec((1, tn), lambda i, j: (0, j)),                   # bias slab
                ],
                out_specs=pl.BlockSpec((bm, tn), lambda i, j: (i, j)),
                out_shape=jax.ShapeDtypeStruct((Rp, D), x.dtype),
                scratch_shapes=[pltpu.VMEM((bm, D), matmul_dtype)],               # normed rows
                compiler_params=pltpu.CompilerParams(
                    dimension_semantics=("parallel", "arbitrary"),
                    vmem_limit_bytes=budget),
                cost_estimate=cost,
            )(x2, x2, g2, be2, w, b2)

        grid = (Rp // bm,)
        cost = pl.CostEstimate(
            flops=2 * Rp * D * D + 10 * Rp * D,
            transcendentals=Rp,
            bytes_accessed=2 * Rp * D * x_isz + D * D * w_isz + 3 * D * 4,
        )
        return pl.pallas_call(
            functools.partial(_fused_prenorm_linear_kernel,
                              eps=float(eps), matmul_dtype=matmul_dtype),
            grid=grid,
            in_specs=[
                pl.BlockSpec((bm, D), lambda i: (i, 0)),                    # x rows
                _resident_spec((1, D), lambda i: (0, 0), single_buffer),    # gamma
                _resident_spec((1, D), lambda i: (0, 0), single_buffer),    # beta
                _resident_spec((D, D), lambda i: (0, 0), single_buffer),    # weight (resident)
                _resident_spec((1, D), lambda i: (0, 0), single_buffer),    # bias
            ],
            out_specs=pl.BlockSpec((bm, D), lambda i: (i, 0)),
            out_shape=jax.ShapeDtypeStruct((Rp, D), x.dtype),
            compiler_params=pltpu.CompilerParams(
                dimension_semantics=("parallel",),
                vmem_limit_bytes=budget),
            cost_estimate=cost,
        )(x2, g2, be2, w, b2)

    try:
        out = _run(single_buffer=True)
    except Exception:
        # Fallback if single-buffering resident operands (pl.Buffered(1)) is
        # rejected by this Pallas/Mosaic build: identical kernel, default buffering.
        out = _run(single_buffer=False)

    return out[:R].reshape(orig_shape)


def layer_norm(x, gamma, beta, eps=1e-5):
    """Standalone Pallas LayerNorm (generic-fn path)."""
    orig = x.shape
    D = int(orig[-1])
    R = int(np.prod(orig[:-1]))
    x_isz = x.dtype.itemsize
    budget = _vmem_budget_bytes()
    row_multiple = 16 if x.dtype == jnp.bfloat16 else 8
    cands = [c for c in _row_candidates(row_multiple) if c <= R] or [R]
    fitting = [c for c in cands if (4 * c * D * x_isz + 3 * c * D * 4) <= budget] or [cands[-1]]
    multi = [c for c in fitting if pl.cdiv(R, c) >= 2]
    bm = multi[0] if multi else fitting[0]
    Rp = pl.cdiv(R, bm) * bm
    x2 = x.reshape(R, D)
    if Rp != R:
        x2 = jnp.pad(x2, ((0, Rp - R), (0, 0)))
    out = pl.pallas_call(
        functools.partial(_layernorm_kernel, eps=float(eps)),
        grid=(Rp // bm,),
        in_specs=[pl.BlockSpec((bm, D), lambda i: (i, 0)),
                  pl.BlockSpec((1, D), lambda i: (0, 0)),
                  pl.BlockSpec((1, D), lambda i: (0, 0))],
        out_specs=pl.BlockSpec((bm, D), lambda i: (i, 0)),
        out_shape=jax.ShapeDtypeStruct((Rp, D), x.dtype),
        compiler_params=pltpu.CompilerParams(
            dimension_semantics=("parallel",), vmem_limit_bytes=budget),
    )(x2, gamma.reshape(1, D), beta.reshape(1, D))
    return out[:R].reshape(orig)


def _residual_add(y, x):
    """Pallas residual-add epilogue (y + x), aliasing y's buffer for the output."""
    orig = x.shape
    D = int(orig[-1])
    R = int(np.prod(orig[:-1]))
    y = y.astype(x.dtype)
    x_isz = x.dtype.itemsize
    budget = _vmem_budget_bytes()
    row_multiple = 16 if x.dtype == jnp.bfloat16 else 8
    cands = [c for c in _row_candidates(row_multiple) if c <= R] or [R]
    fitting = [c for c in cands if 6 * c * D * x_isz <= budget] or [cands[-1]]
    multi = [c for c in fitting if pl.cdiv(R, c) >= 2]
    bm = multi[0] if multi else fitting[0]
    Rp = pl.cdiv(R, bm) * bm
    y2 = y.reshape(R, D)
    x2 = x.reshape(R, D)
    if Rp != R:
        y2 = jnp.pad(y2, ((0, Rp - R), (0, 0)))
        x2 = jnp.pad(x2, ((0, Rp - R), (0, 0)))
    out = pl.pallas_call(
        _residual_add_kernel,
        grid=(Rp // bm,),
        in_specs=[pl.BlockSpec((bm, D), lambda i: (i, 0)),
                  pl.BlockSpec((bm, D), lambda i: (i, 0))],
        out_specs=pl.BlockSpec((bm, D), lambda i: (i, 0)),
        out_shape=jax.ShapeDtypeStruct((Rp, D), x.dtype),
        input_output_aliases={0: 0},
        compiler_params=pltpu.CompilerParams(
            dimension_semantics=("parallel",), vmem_limit_bytes=budget),
    )(y2, x2)
    return out[:R].reshape(orig)


def pre_norm_residual(x, fn, gamma, beta, eps=1e-5):
    """Generic PreNormResidual: fn(LayerNorm(x)) + x for an arbitrary JAX fn."""
    # TODO(synk): an arbitrary fn (e.g. attention mixing tokens) cannot be fused
    # into the row-tiled kernel; it runs as ordinary JAX between the Pallas
    # LayerNorm and the Pallas residual-add epilogue.  For fn = Linear use
    # pre_norm_residual_linear (fully fused, one pallas_call).
    return _residual_add(fn(layer_norm(x, gamma, beta, eps)), x)


# ---------------------------------------------------------------------------
# Pure-JAX reference (mirrors nn.LayerNorm(dim) -> Linear -> + x)
# ---------------------------------------------------------------------------
def ref_pre_norm_residual_linear(x, gamma, beta, w, b, eps=1e-5):
    xf = x.astype(jnp.float32)
    mean = jnp.mean(xf, axis=-1, keepdims=True)
    var = jnp.mean((xf - mean) ** 2, axis=-1, keepdims=True)
    normed = (xf - mean) / jnp.sqrt(var + eps) * gamma.astype(jnp.float32) \
        + beta.astype(jnp.float32)
    y = jnp.dot(normed, w.astype(jnp.float32),
                precision=jax.lax.Precision.HIGHEST) + b.astype(jnp.float32)
    return (y + xf).astype(x.dtype)


if __name__ == "__main__":
    key = jax.random.PRNGKey(0)
    k = jax.random.split(key, 10)

    # --- 1. Fully fused path: (batch=2, seq=8, dim=32), f32 ------------------
    B, S, D = 2, 8, 32
    x = jax.random.normal(k[0], (B, S, D), jnp.float32)
    gamma = 1.0 + 0.1 * jax.random.normal(k[1], (D,), jnp.float32)
    beta = 0.1 * jax.random.normal(k[2], (D,), jnp.float32)
    w = 0.1 * jax.random.normal(k[3], (D, D), jnp.float32)     # fn weight, (in, out)
    b = 0.1 * jax.random.normal(k[4], (D,), jnp.float32)

    out = jax.block_until_ready(pre_norm_residual_linear(x, gamma, beta, w, b))
    ref = ref_pre_norm_residual_linear(x, gamma, beta, w, b)
    np.testing.assert_allclose(np.asarray(out), np.asarray(ref), atol=2e-2, rtol=2e-2)

    # --- 2. Generic-fn path: Pallas LayerNorm + JAX fn + Pallas residual add -
    fn = lambda z: jnp.dot(z, w) + b
    out_g = jax.block_until_ready(pre_norm_residual(x, fn, gamma, beta))
    np.testing.assert_allclose(np.asarray(out_g), np.asarray(ref), atol=2e-2, rtol=2e-2)

    # --- 3. N-tiled large-D path (forced), f32, D=256 with two N tiles -------
    R2, D2 = 256, 256
    x2 = jax.random.normal(k[5], (R2, D2), jnp.float32)
    g2 = 1.0 + 0.1 * jax.random.normal(k[6], (D2,), jnp.float32)
    be2 = 0.1 * jax.random.normal(k[7], (D2,), jnp.float32)
    w2 = 0.05 * jax.random.normal(k[8], (D2, D2), jnp.float32)
    b2 = 0.1 * jax.random.normal(k[9], (D2,), jnp.float32)
    out_nt = jax.block_until_ready(
        pre_norm_residual_linear(x2, g2, be2, w2, b2, force_path="ntiled", tile_n=128))
    ref_nt = ref_pre_norm_residual_linear(x2, g2, be2, w2, b2)
    np.testing.assert_allclose(np.asarray(out_nt), np.asarray(ref_nt), atol=2e-2, rtol=2e-2)

    # --- 4. bf16 activations: native bf16 MXU operands, f32 stats/accum ------
    xb = x2.astype(jnp.bfloat16)
    out_bf = jax.block_until_ready(pre_norm_residual_linear(xb, g2, be2, w2, b2))
    ref_bf = ref_pre_norm_residual_linear(xb, g2, be2, w2, b2)
    np.testing.assert_allclose(np.asarray(out_bf, np.float32),
                               np.asarray(ref_bf, np.float32), atol=1e-1, rtol=1e-1)

    print("KERNEL_OK")
</pallas_src>

<mosaic_0001>
module attributes {stable_mosaic.version = 11 : i64} {
  func.func @_fused_prenorm_linear_kernel(%arg0: i32, %arg1: memref<8x32xf32, #tpu.memory_space<vmem>>, %arg2: memref<1x32xf32, #tpu.memory_space<vmem>>, %arg3: memref<1x32xf32, #tpu.memory_space<vmem>>, %arg4: memref<32x32xf32, #tpu.memory_space<vmem>>, %arg5: memref<1x32xf32, #tpu.memory_space<vmem>>, %arg6: memref<8x32xf32, #tpu.memory_space<vmem>>) attributes {dimension_semantics = [#tpu.dimension_semantics<parallel>], iteration_bounds = array<i64: 2>, scalar_prefetch = 0 : i64, scratch_operands = 0 : i64, tpu.core_type = #tpu.core_type<tc>, window_params = [{transform_indices = @transform_0, window_bounds = array<i64: 8, 32>}, {pipeline_mode = #tpu.pipeline_mode<synchronous>, transform_indices = @transform_1, window_bounds = array<i64: 1, 32>}, {pipeline_mode = #tpu.pipeline_mode<synchronous>, transform_indices = @transform_2, window_bounds = array<i64: 1, 32>}, {pipeline_mode = #tpu.pipeline_mode<synchronous>, transform_indices = @transform_3, window_bounds = array<i64: 32, 32>}, {pipeline_mode = #tpu.pipeline_mode<synchronous>, transform_indices = @transform_4, window_bounds = array<i64: 1, 32>}, {transform_indices = @transform_5, window_bounds = array<i64: 8, 32>}]} {
    %c0 = arith.constant 0 : index
    %c0_0 = arith.constant 0 : index
    %0 = vector.load %arg1[%c0, %c0_0] : memref<8x32xf32, #tpu.memory_space<vmem>>, vector<8x32xf32>
    %cst = arith.constant dense<0.000000e+00> : vector<8xf32>
    %1 = vector.multi_reduction <add>, %0, %cst [1] : vector<8x32xf32> to vector<8xf32>
    %2 = vector.shape_cast %1 : vector<8xf32> to vector<8x1xf32>
    %cst_1 = arith.constant 3.200000e+01 : f32
    %3 = vector.broadcast %cst_1 : f32 to vector<8x1xf32>
    %4 = arith.divf %2, %3 : vector<8x1xf32>
    %5 = vector.broadcast %4 : vector<8x1xf32> to vector<8x32xf32>
    %6 = arith.subf %0, %5 : vector<8x32xf32>
    %7 = arith.mulf %6, %6 : vector<8x32xf32>
    %cst_2 = arith.constant dense<0.000000e+00> : vector<8xf32>
    %8 = vector.multi_reduction <add>, %7, %cst_2 [1] : vector<8x32xf32> to vector<8xf32>
    %9 = vector.shape_cast %8 : vector<8xf32> to vector<8x1xf32>
    %cst_3 = arith.constant 3.200000e+01 : f32
    %10 = vector.broadcast %cst_3 : f32 to vector<8x1xf32>
    %11 = arith.divf %9, %10 : vector<8x1xf32>
    %cst_4 = arith.constant 9.99999974E-6 : f32
    %12 = vector.broadcast %cst_4 : f32 to vector<8x1xf32>
    %13 = arith.addf %11, %12 : vector<8x1xf32>
    %14 = math.rsqrt %13 : vector<8x1xf32>
    %15 = vector.broadcast %14 : vector<8x1xf32> to vector<8x32xf32>
    %16 = arith.mulf %6, %15 : vector<8x32xf32>
    %c0_5 = arith.constant 0 : index
    %c0_6 = arith.constant 0 : index
    %17 = vector.load %arg2[%c0_5, %c0_6] : memref<1x32xf32, #tpu.memory_space<vmem>>, vector<1x32xf32>
    %18 = vector.broadcast %17 : vector<1x32xf32> to vector<8x32xf32>
    %19 = arith.mulf %16, %18 : vector<8x32xf32>
    %c0_7 = arith.constant 0 : index
    %c0_8 = arith.constant 0 : index
    %20 = vector.load %arg3[%c0_7, %c0_8] : memref<1x32xf32, #tpu.memory_space<vmem>>, vector<1x32xf32>
    %21 = vector.broadcast %20 : vector<1x32xf32> to vector<8x32xf32>
    %22 = arith.addf %19, %21 : vector<8x32xf32>
    %c0_9 = arith.constant 0 : index
    %c0_10 = arith.constant 0 : index
    %23 = vector.load %arg4[%c0_9, %c0_10] : memref<32x32xf32, #tpu.memory_space<vmem>>, vector<32x32xf32>
    %cst_11 = arith.constant dense<0.000000e+00> : vector<8x32xf32>
    %24 = tpu.matmul %22, %23, %cst_11 {dimension_numbers = #tpu.dot_dimension_numbers<[1], [0], [0], [1], [0, 0, 1, 1], [], []>} : vector<8x32xf32>, vector<32x32xf32>, vector<8x32xf32> -> vector<8x32xf32>
    %c0_12 = arith.constant 0 : index
    %c0_13 = arith.constant 0 : index
    %25 = vector.load %arg5[%c0_12, %c0_13] : memref<1x32xf32, #tpu.memory_space<vmem>>, vector<1x32xf32>
    %26 = vector.broadcast %25 : vector<1x32xf32> to vector<8x32xf32>
    %27 = arith.addf %24, %26 : vector<8x32xf32>
    %c0_14 = arith.constant 0 : index
    %c0_15 = arith.constant 0 : index
    %28 = vector.load %arg1[%c0_14, %c0_15] : memref<8x32xf32, #tpu.memory_space<vmem>>, vector<8x32xf32>
    %29 = arith.addf %27, %28 : vector<8x32xf32>
    %c0_16 = arith.constant 0 : index
    %c0_17 = arith.constant 0 : index
    %30 = vector.load %arg6[%c0_16, %c0_17] : memref<8x32xf32, #tpu.memory_space<vmem>>, vector<8x32xf32>
    tpu.vector_store %arg6[%c0_16, %c0_17], %29 {strides = array<i32>} : memref<8x32xf32, #tpu.memory_space<vmem>>, vector<8x32xf32>,
    return
  }
  func.func @transform_0(%arg0: i32) -> (i32, i32) {
    %c0_i32 = arith.constant 0 : i32
    %c0_i32_0 = arith.constant 0 : i32
    return %arg0, %c0_i32 : i32, i32
  }
  func.func @transform_1(%arg0: i32) -> (i32, i32) {
    %c0_i32 = arith.constant 0 : i32
    %c0_i32_0 = arith.constant 0 : i32
    %c0_i32_1 = arith.constant 0 : i32
    return %c0_i32, %c0_i32_0 : i32, i32
  }
  func.func @transform_2(%arg0: i32) -> (i32, i32) {
    %c0_i32 = arith.constant 0 : i32
    %c0_i32_0 = arith.constant 0 : i32
    %c0_i32_1 = arith.constant 0 : i32
    return %c0_i32, %c0_i32_0 : i32, i32
  }
  func.func @transform_3(%arg0: i32) -> (i32, i32) {
    %c0_i32 = arith.constant 0 : i32
    %c0_i32_0 = arith.constant 0 : i32
    %c0_i32_1 = arith.constant 0 : i32
    return %c0_i32, %c0_i32_0 : i32, i32
  }
  func.func @transform_4(%arg0: i32) -> (i32, i32) {
    %c0_i32 = arith.constant 0 : i32
    %c0_i32_0 = arith.constant 0 : i32
    %c0_i32_1 = arith.constant 0 : i32
    return %c0_i32, %c0_i32_0 : i32, i32
  }
  func.func @transform_5(%arg0: i32) -> (i32, i32) {
    %c0_i32 = arith.constant 0 : i32
    %c0_i32_0 = arith.constant 0 : i32
    return %arg0, %c0_i32 : i32, i32
  }
}

module attributes {stable_mosaic.version = 11 : i64} {
  func.func @_fused_prenorm_linear_kernel(%arg0: i32, %arg1: memref<8x32xf32, #tpu.memory_space<vmem>>, %arg2: memref<1x32xf32, #tpu.memory_space<vmem>>, %arg3: memref<1x32xf32, #tpu.memory_space<vmem>>, %arg4: memref<32x32xf32, #tpu.memory_space<vmem>>, %arg5: memref<1x32xf32, #tpu.memory_space<vmem>>, %arg6: memref<8x32xf32, #tpu.memory_space<vmem>>) attributes {dimension_semantics = [#tpu.dimension_semantics<parallel>], iteration_bounds = array<i64: 2>, scalar_prefetch = 0 : i64, scratch_operands = 0 : i64, tpu.core_type = #tpu.core_type<tc>, window_params = [{transform_indices = @transform_0, window_bounds = array<i64: 8, 32>}, {pipeline_mode = #tpu.pipeline_mode<synchronous>, transform_indices = @transform_1, window_bounds = array<i64: 1, 32>}, {pipeline_mode = #tpu.pipeline_mode<synchronous>, transform_indices = @transform_2, window_bounds = array<i64: 1, 32>}, {pipeline_mode = #tpu.pipeline_mode<synchronous>, transform_indices = @transform_3, window_bounds = array<i64: 32, 32>}, {pipeline_mode = #tpu.pipeline_mode<synchronous>, transform_indices = @transform_4, window_bounds = array<i64: 1, 32>}, {transform_indices = @transform_5, window_bounds = array<i64: 8, 32>}]} {
    %c0 = arith.constant 0 : index
    %c0_0 = arith.constant 0 : index
    %0 = vector.load %arg1[%c0, %c0_0] : memref<8x32xf32, #tpu.memory_space<vmem>>, vector<8x32xf32>
    %cst = arith.constant dense<0.000000e+00> : vector<8xf32>
    %1 = vector.multi_reduction <add>, %0, %cst [1] : vector<8x32xf32> to vector<8xf32>
    %2 = vector.shape_cast %1 : vector<8xf32> to vector<8x1xf32>
    %cst_1 = arith.constant 3.200000e+01 : f32
    %3 = vector.broadcast %cst_1 : f32 to vector<8x1xf32>
    %4 = arith.divf %2, %3 : vector<8x1xf32>
    %5 = vector.broadcast %4 : vector<8x1xf32> to vector<8x32xf32>
    %6 = arith.subf %0, %5 : vector<8x32xf32>
    %7 = arith.mulf %6, %6 : vector<8x32xf32>
    %cst_2 = arith.constant dense<0.000000e+00> : vector<8xf32>
    %8 = vector.multi_reduction <add>, %7, %cst_2 [1] : vector<8x32xf32> to vector<8xf32>
    %9 = vector.shape_cast %8 : vector<8xf32> to vector<8x1xf32>
    %cst_3 = arith.constant 3.200000e+01 : f32
    %10 = vector.broadcast %cst_3 : f32 to vector<8x1xf32>
    %11 = arith.divf %9, %10 : vector<8x1xf32>
    %cst_4 = arith.constant 9.99999974E-6 : f32
    %12 = vector.broadcast %cst_4 : f32 to vector<8x1xf32>
    %13 = arith.addf %11, %12 : vector<8x1xf32>
    %14 = math.rsqrt %13 : vector<8x1xf32>
    %15 = vector.broadcast %14 : vector<8x1xf32> to vector<8x32xf32>
    %16 = arith.mulf %6, %15 : vector<8x32xf32>
    %c0_5 = arith.constant 0 : index
    %c0_6 = arith.constant 0 : index
    %17 = vector.load %arg2[%c0_5, %c0_6] : memref<1x32xf32, #tpu.memory_space<vmem>>, vector<1x32xf32>
    %18 = vector.broadcast %17 : vector<1x32xf32> to vector<8x32xf32>
    %19 = arith.mulf %16, %18 : vector<8x32xf32>
    %c0_7 = arith.constant 0 : index
    %c0_8 = arith.constant 0 : index
    %20 = vector.load %arg3[%c0_7, %c0_8] : memref<1x32xf32, #tpu.memory_space<vmem>>, vector<1x32xf32>
    %21 = vector.broadcast %20 : vector<1x32xf32> to vector<8x32xf32>
    %22 = arith.addf %19, %21 : vector<8x32xf32>
    %c0_9 = arith.constant 0 : index
    %c0_10 = arith.constant 0 : index
    %23 = vector.load %arg4[%c0_9, %c0_10] : memref<32x32xf32, #tpu.memory_space<vmem>>, vector<32x32xf32>
    %cst_11 = arith.constant dense<0.000000e+00> : vector<8x32xf32>
    %24 = tpu.matmul %22, %23, %cst_11 {dimension_numbers = #tpu.dot_dimension_numbers<[1], [0], [0], [1], [0, 0, 1, 1], [], []>} : vector<8x32xf32>, vector<32x32xf32>, vector<8x32xf32> -> vector<8x32xf32>
    %c0_12 = arith.constant 0 : index
    %c0_13 = arith.constant 0 : index
    %25 = vector.load %arg5[%c0_12, %c0_13] : memref<1x32xf32, #tpu.memory_space<vmem>>, vector<1x32xf32>
    %26 = vector.broadcast %25 : vector<1x32xf32> to vector<8x32xf32>
    %27 = arith.addf %24, %26 : vector<8x32xf32>
    %c0_14 = arith.constant 0 : index
    %c0_15 = arith.constant 0 : index
    %28 = vector.load %arg1[%c0_14, %c0_15] : memref<8x32xf32, #tpu.memory_space<vmem>>, vector<8x32xf32>
    %29 = arith.addf %27, %28 : vector<8x32xf32>
    %c0_16 = arith.constant 0 : index
    %c0_17 = arith.constant 0 : index
    %30 = vector.load %arg6[%c0_16, %c0_17] : memref<8x32xf32, #tpu.memory_space<vmem>>, vector<8x32xf32>
    tpu.vector_store %arg6[%c0_16, %c0_17], %29 {strides = array<i32>} : memref<8x32xf32, #tpu.memory_space<vmem>>, vector<8x32xf32>,
    return
  }
  func.func @transform_0(%arg0: i32) -> (i32, i32) {
    %c0_i32 = arith.constant 0 : i32
    %c0_i32_0 = arith.constant 0 : i32
    return %arg0, %c0_i32 : i32, i32
  }
  func.func @transform_1(%arg0: i32) -> (i32, i32) {
    %c0_i32 = arith.constant 0 : i32
    %c0_i32_0 = arith.constant 0 : i32
    %c0_i32_1 = arith.constant 0 : i32
    return %c0_i32, %c0_i32_0 : i32, i32
  }
  func.func @transform_2(%arg0: i32) -> (i32, i32) {
    %c0_i32 = arith.constant 0 : i32
    %c0_i32_0 = arith.constant 0 : i32
    %c0_i32_1 = arith.constant 0 : i32
    return %c0_i32, %c0_i32_0 : i32, i32
  }
  func.func @transform_3(%arg0: i32) -> (i32, i32) {
    %c0_i32 = arith.constant 0 : i32
    %c0_i32_0 = arith.constant 0 : i32
    %c0_i32_1 = arith.constant 0 : i32
    return %c0_i32, %c0_i32_0 : i32, i32
  }
  func.func @transform_4(%arg0: i32) -> (i32, i32) {
    %c0_i32 = arith.constant 0 : i32
    %c0_i32_0 = arith.constant 0 : i32
    %c0_i32_1 = arith.constant 0 : i32
    return %c0_i32, %c0_i32_0 : i32, i32
  }
  func.func @transform_5(%arg0: i32) -> (i32, i32) {
    %c0_i32 = arith.constant 0 : i32
    %c0_i32_0 = arith.constant 0 : i32
    return %arg0, %c0_i32 : i32, i32
  }
}

</mosaic_0001>

<bundles_post_ra>
// kernel: tpu_custom_call.1
= control target key start
LH: loop header
LB: loop body
LE: loop exit
PB: predicated region body
PF: predicated region fallthrough
CT: control target
= control target key end

     0   :  { %10 = vsyncpa [#allocation3], 0  ;;  %s898_s0 = inlined_call_operand.hbm [shape: f32[16,32], index: 0, kind: input, shape index: {}]   ;;  %s899_s1 = inlined_call_operand.hbm [shape: f32[1,32], index: 1, kind: input, shape index: {}]   ;;  %s900_s2 = inlined_call_operand.vmem [shape: f32[1,32], index: 2, kind: input, shape index: {}]   ;;  %s901_s3 = inlined_call_operand.hbm [shape: f32[32,32], index: 3, kind: input, shape index: {}]   ;;  %s902_s4 = inlined_call_operand.vmem [shape: f32[1,32], index: 4, kind: input, shape index: {}]   ;;  %s903_s5 = inlined_call_operand.hbm [shape: f32[16,32], index: 5, kind: output, shape index: {}]  }
   0x1   :  { %12 = vsyncpa [#allocation3 + $0x1], 0 }
   0x2   :  { %13 = vsyncpa [#allocation6], 0 }
   0x3   :  { %14 = vsyncpa [#allocation4], 0 }
   0x4   :  { %16 = vsyncpa [#allocation4 + $0x1], 0  ;;  %s743_s18 = smov 0   ;;  %s745_s19 = smov 0  }
   0x5   :  { %s747_s20 = smov 0   ;;  %s749_s21 = smov 0  }
   0x6 LB: > { %s764_s22 = sadd.s32 4294967295, %s706_s21   ;;  %s452_s23 = sadd.s32 4294967294, %s706_s21   ;;  %s706_s21 = sphi %s749_s21, %s913_s21   ;;  %s702_s20 = sphi %s747_s20, %s912_s20   ;;  %s698_s19 = sphi %s745_s19, %s911_s19   ;;  %s694_s18 = sphi %s743_s18, %s910_s18  }
   0x7   : > { %p42_p0 = scmp.ne.s32.totalorder %s698_s19, %s694_s18  ;;  %p43_p1 = scmp.eq.s32.totalorder %s764_s22, 0 }
   0x8   : > { %p150_p2 = scmp.eq.s32.totalorder %s764_s22, 1  ;;  %p156_p3 = scmp.eq.s32.totalorder %s452_s23, 1 }
   0x9   : > { %p773_p4 = por %p43_p1, %p42_p0  ;;  %p453_p5 = scmp.ge.s32.totalorder %s706_s21, 1 }
   0xa   : > { %p778_p6 = por %p156_p3, %p42_p0  ;;  %p163_p7 = scmp.lt.s32.totalorder %s706_s21, 3 }
   0xb   : > { %s175_s28 = sshll.u32 %s899_s1, 4  ;;  %s708_s30 = smov [#allocation5]   ;;  %s176_s28 = int_to_ptr.hbm [resolvable:$true] %s175_s28 }
   0xc   : > { %p786_p8 = pnand %p453_p5, %p163_p7  ;;  %s177_s6 = sshll.u32 %s708_s30, 4  ;;  %s178_s6 = int_to_ptr.vmem [resolvable:$true] %s177_s6 }
   0xd   : > { %s189_s9 = sshll.u32 %s901_s3, 4  ;;  %s709_s10 = smov [#allocation7]   ;;  %s190_s9 = int_to_ptr.hbm [resolvable:$true] %s189_s9 }
   0xe   : > { %p481_p10 = pneg %p786_p8  ;;  %s191_s11 = sshll.u32 %s709_s10, 4  ;;  %s192_s11 = int_to_ptr.vmem [resolvable:$true] %s191_s11 }
   0xf   : > { %s710_s12 = smov 128   ;;  %s711_s13 = smov 8  }
  0x10   : > { %p482_p11 = pnand %p481_p10, %p43_p1  ;;  %s799_s14 = sadd.s32 1, %s706_s21  }
  0x11   : > { %s26_s15 = ssub.s32 %s706_s21, %s799_s14  ;;  %s29_s16 = sadd.s32 1, %s702_s20 }
  0x12   : > { %484 = dma.hbm_to_vmem [thread:$0]  (!%p482_p11), %s176_s28, 16, %s178_s6, [#allocation6]  }
  0x13   : > { %487 = dma.hbm_to_vmem [thread:$0]  (!%p482_p11), %s190_s9, 512, %s192_s11, [#allocation6], %s710_s12, %s710_s12, %s711_s13  }
  0x14   : > { %p27_p12 = scmp.eq.s32.totalorder %s26_s15, 0  ;;  %p36_p13 = scmp.ne.s32.totalorder %s702_s20, %s698_s19 }
  0x15   : > { %p37_p0 = scmp.eq.s32.totalorder %s706_s21, 0  ;;  %p498_p7 = scmp.lt.s32.totalorder %s706_s21, 2 }
  0x16   : > { %s808_s17 = scalar_select %p27_p12, %s702_s20, %s29_s16  }
  0x17   : > { %p38_p3 = por %p37_p0, %p36_p13  ;;  %p812_p5 = por %p150_p2, %p36_p13 }
  0x18   : > { %s208_s26 = sand.u32 1, %s702_s20   ;;  %s458_s28 = sshll.u32 %s706_s21, 3 }
  0x19   : > { %s457_s27 = sshll.u32 %s208_s26, 3  ;;  %s216_s7 = scalar_lea.hbm %s898_s0, %s458_s28 }
  0x1a   : > { %s212_s8 = scalar_lea.vmem [#allocation2], %s457_s27  ;;  %s218_s10 = sshll.u32 %s216_s7, 4  ;;  %s219_s10 = int_to_ptr.hbm [resolvable:$true] %s218_s10 }
  0x1b   : > { %s220_s9 = sshll.u32 %s212_s8, 4  ;;  %p822_p10 = pnand %p498_p7, %p38_p3  ;;  %s221_s9 = int_to_ptr.vmem [resolvable:$true] %s220_s9 }
  0x1c   : > { %s209_s12 = scalar_lea.sflag [#allocation3], %s208_s26  ;;  %s606_s13 = sshra.s32 %s219_s10, 4  ;;  %s607_s13 = int_to_ptr.hbm [resolvable:$true] %s606_s13 }
  0x1d   : > { %s608_s15 = scalar_lea.hbm %s607_s13, 8  ;;  %p610_p11 = pneg %p822_p10 }
  0x1e   : > { %p609_p2 = scmp.ne.s32.totalorder %s607_s13, %s608_s15  ;;  %s613_s28 = scalar_lea.hbm %s898_s0, 16 }
  0x1f   : > { %p614_p0 = scmp.lt.s32.totalorder %s607_s13, %s898_s0  ;;  %p615_p3 = scmp.lt.s32.totalorder %s613_s28, %s608_s15 }
  0x20   : > { %p611_p12 = pnand %p610_p11, %p609_p2 }
  0x21   : > { %p616_p7 = por %p615_p3, %p614_p0 }
  0x22   : > { %p612_p13 = pneg %p611_p12 }
  0x24   : > { %p617_p9 = pnand %p616_p7, %p612_p13 }
  0x26   : > { %620 = shalt.err (!%p617_p9)
}
  0x27   : > { %491 = dma.hbm_to_vmem [thread:$0]  (!%p822_p10), %s219_s10, 128, %s221_s9, %s209_s12  }
  0x28   : > { %229 = sbr.rel (%p786_p8) target bundleno = 450 (0x1c2), region = 40  ;;  %s839_s26 = sand.u32 (!%p786_p8), 1, %s698_s19  }
  0x29   : > { %s460_s7 = sshll.u32 (!%p786_p8), %s839_s26, 3  ;;  %s232_s8 = scalar_lea.sflag (!%p786_p8), [#allocation3], %s839_s26 }
  0x2a   : > { %s235_s13 = scalar_lea.vmem (!%p786_p8), [#allocation2], %s460_s7 }
  0x2d   : > { %681 = dma.done.wait (%p773_p4), %s232_s8, 128  }
  0x2e   : > { %683 = vsyncadd (%p773_p4), %s232_s8, 4294967168 }
  0x2f   : > { %685 = dma.done.wait (%p43_p1), [#allocation6], 528  }
  0x30   : > { %687 = vsyncadd (%p43_p1), [#allocation6], 4294966768  ;;  %vm274_vm0 = vcmask 261120   ;;  %v273_v0 = vld [vmem:[%s235_s13] sm:$0xff]  ;;  %v712_v2 = vmov 32.0   ;;  %v314_v17 = vld [vmem:[#allocation7] sm:$0xff] }
  0x31   : > { %v275_v1 = vsel %vm274_vm0, %v273_v0, 0.0  ;;  %542 = vrcp.f32 %v712_v2  ;;  %v317_v14 = vld [vmem:[#allocation7 + $0x18] sm:$0xff]  ;;  %v316_v15 = vld [vmem:[#allocation7 + $0x10] sm:$0xff]  ;;  %v315_v16 = vld [vmem:[#allocation7 + $0x8] sm:$0xff]  ;;  %s466_s9 = sshll.u32 %s764_s22, 3  ;;  %s272_s27 = scalar_lea.vmem [#allocation8], %s460_s7 }
  0x32   : > { %276 = vadd.xlane.f32.xlu0 %v275_v1  ;;  %337 = vmatpush.msra.mxu0 %v317_v14  ;;  %v539_v27 = vld [vmem:[#allocation5] ss:$0 sm:$0xff]  ;;  %v540_v30 = vld [vmem:[%s900_s2] ss:$0 sm:$0xff]  ;;  %s358_s16 = scalar_lea.hbm %s903_s5, %s466_s9  ;;  %s360_s28 = sshll.u32 %s272_s27, 4  ;;  %s361_s28 = int_to_ptr.vmem [resolvable:$true] %s360_s28 }
  0x33   : > { %v541_v33 = vld [vmem:[%s902_s4] ss:$0 sm:$0xff]  ;;  %s362_s30 = sshll.u32 %s358_s16, 4  ;;  %s348_s22 = scalar_lea.sflag [#allocation4], %s839_s26  ;;  %s363_s30 = int_to_ptr.hbm [resolvable:$true] %s362_s30 }
  0x34   : > { %338 = vmatpush.msra.mxu0 %v316_v15  ;;  %s650_s6 = sshra.s32 %s363_s30, 4  ;;  %s656_s7 = scalar_lea.hbm %s903_s5, 16  ;;  %s651_s6 = int_to_ptr.hbm [resolvable:$true] %s650_s6 }
  0x35   : > { %s652_s8 = scalar_lea.hbm %s651_s6, 8  ;;  %p657_p9 = scmp.lt.s32.totalorder %s651_s6, %s903_s5 }
  0x36   : > { %339 = vmatpush.msra.mxu0 %v315_v16  ;;  %p653_p1 = scmp.ne.s32.totalorder %s651_s6, %s652_s8  ;;  %p658_p10 = scmp.lt.s32.totalorder %s656_s7, %s652_s8 }
  0x37   : > { %v543_v3 = vpop.eup %542 }
  0x38   : > { %v279_v4 = vmul.f32 32.0, %v543_v3  ;;  %vm283_vm1 = vweird.f32 %v543_v3  ;;  %340 = vmatpush.msra.mxu0 %v314_v17  ;;  %p654_p4 = pnand %p653_p1, %p812_p5  ;;  %p659_p2 = por %p658_p10, %p657_p9 }
  0x3a   : > { %v280_v5 = vsub.f32 1.0, %v279_v4  ;;  %p655_p8 = pneg %p654_p4 }
  0x3c   : > { %v281_v6 = vmul.f32 %v543_v3, %v280_v5  ;;  %p660_p11 = pnand %p659_p2, %p655_p8 }
  0x3e   : > { %v282_v7 = vadd.f32 %v543_v3, %v281_v6 }
  0x40   : > { %v284_v8 = vsel %vm283_vm1, %v543_v3, %v282_v7 }
  0xa5   : > { %v277_v9 = vpop.xlane.xlu0 %276 }
  0xa6   : > { %v285_v10 = vmul.f32 %v284_v8, %v277_v9 }
  0xa8   : > { %v286_v11 = vsub.f32 %v273_v0, %v285_v10 }
  0xaa   : > { %v287_v12 = vmul.f32 %v286_v11, %v286_v11 }
  0xac   : > { %v288_v13 = vsel %vm274_vm0, %v287_v12, 0.0 }
  0xad   : > { %289 = vadd.xlane.f32.xlu0 %v288_v13 }
 0x120   : > { %v290_v18 = vpop.xlane.xlu0 %289 }
 0x121   : > { %v291_v19 = vmul.f32 %v290_v18, %v284_v8 }
 0x123   : > { %v292_v20 = vadd.f32 1e-05, %v291_v19 }
 0x125   : > { %544 = vrsqrt.f32 %v292_v20  ;;  %vm299_vm3 = vweird.f32 %v292_v20 }
 0x12b   : > { %v545_v21 = vpop.eup %544 }
 0x12c   : > { %v294_v22 = vmul.f32 %v545_v21, %v292_v20  ;;  %vm300_vm2 = vweird.f32 %v545_v21 }
 0x12d   : > { %vm301_vm4 = vmor %vm299_vm3, %vm300_vm2 }
 0x12e   : > { %v295_v23 = vmul.f32 %v545_v21, %v294_v22 }
 0x130   : > { %v296_v24 = vmul.f32 0.5, %v295_v23 }
 0x132   : > { %v297_v25 = vsub.f32 1.5, %v296_v24 }
 0x134   : > { %v298_v26 = vmul.f32 %v545_v21, %v297_v25 }
 0x136   : > { %v302_v28 = vsel %vm301_vm4, %v545_v21, %v298_v26 }
 0x137   : > { %v303_v29 = vmul.f32 %v302_v28, %v286_v11 }
 0x139   : > { %v308_v31 = vmul.f32 %v539_v27, %v303_v29 }
 0x13b   : > { %v313_v32 = vadd.f32 %v540_v30, %v308_v31 }
 0x13d   : > { %464 = vmatmul.msk.f32.vlgmr.msra.gmra.mxu0 %vm274_vm0, %v313_v32 }
 0x1ba   : > { %v342_v34 = vpop.f32.mrf.mxu0 }
 0x1bb   : > { %v343_v35 = vadd.f32 %v541_v33, %v342_v34 }
 0x1bd   : > { %v345_v36 = vadd.f32 %v343_v35, %v273_v0 }
 0x1bf   : > { %346 = vst.msk [vmem:[%s272_s27] sm:$0xff] %vm274_vm0, %v345_v36 }
 0x1c0   : > { %663 = shalt.err (!%p660_p11)
}
 0x1c1   : > { %479 = dma.vmem_to_hbm [thread:$0]  (%p812_p5), %s361_s28, 128, %s363_s30, %s348_s22  }
 0x1c2 PF: > { %s374_s26 = sand.u32 1, %s694_s18   ;;  %p909_p12 = scmp.ge.s32.totalorder %s706_s21, 2 }
 0x1c3   : > { %s375_s10 = scalar_lea.sflag [#allocation4], %s374_s26 }
 0x1c4   : > { %p493_p13 = pnand %p909_p12, %p778_p6 }
 0x1c6   : > { %p494_p0 = pneg %p493_p13 }
 0x1c8   : > { %689 = dma.done.wait (%p494_p0), %s375_s10, 128  }
 0x1c9   : > { %691 = vsyncadd (%p494_p0), %s375_s10, 4294967168  ;;  %p19_p3 = scmp.ge.s32.totalorder %s799_s14, 4   ;;  %s910_s18 = smov %s698_s19 }
 0x1ca   : > { %s911_s19 = smov %s702_s20  ;;  %s912_s20 = smov %s808_s17 }
 0x1cb   : > { %s913_s21 = smov %s799_s14  ;;  %21 = sbr.rel (!%p19_p3) target bundleno = 6 (0x6), region = 93 }
 0x1d0   :  { %381 = vsyncpa [#allocation3], 1 }
 0x1d1   :  { %383 = vsyncpa [#allocation3 + $0x1], 1 }
 0x1d2   :  { %384 = vsyncpa [#allocation6], 1 }
 0x1d3   :  { %385 = vsyncpa [#allocation4], 1 }
 0x1d4   :  { %387 = vsyncpa [#allocation4 + $0x1], 1 }

// kernel: tpu_custom_call.1
= control target key start
LH: loop header
LB: loop body
LE: loop exit
PB: predicated region body
PF: predicated region fallthrough
CT: control target
= control target key end

     0   :  { %10 = vsyncpa [#allocation3], 0  ;;  %s898_s0 = inlined_call_operand.hbm [shape: f32[16,32], index: 0, kind: input, shape index: {}]   ;;  %s899_s1 = inlined_call_operand.hbm [shape: f32[1,32], index: 1, kind: input, shape index: {}]   ;;  %s900_s2 = inlined_call_operand.vmem [shape: f32[1,32], index: 2, kind: input, shape index: {}]   ;;  %s901_s3 = inlined_call_operand.hbm [shape: f32[32,32], index: 3, kind: input, shape index: {}]   ;;  %s902_s4 = inlined_call_operand.vmem [shape: f32[1,32], index: 4, kind: input, shape index: {}]   ;;  %s903_s5 = inlined_call_operand.hbm [shape: f32[16,32], index: 5, kind: output, shape index: {}]  }
   0x1   :  { %12 = vsyncpa [#allocation3 + $0x1], 0 }
   0x2   :  { %13 = vsyncpa [#allocation6], 0 }
   0x3   :  { %14 = vsyncpa [#allocation4], 0 }
   0x4   :  { %16 = vsyncpa [#allocation4 + $0x1], 0  ;;  %s743_s18 = smov 0   ;;  %s745_s19 = smov 0  }
   0x5   :  { %s747_s20 = smov 0   ;;  %s749_s21 = smov 0  }
   0x6 LB: > { %s764_s22 = sadd.s32 4294967295, %s706_s21   ;;  %s452_s23 = sadd.s32 4294967294, %s706_s21   ;;  %s706_s21 = sphi %s749_s21, %s913_s21   ;;  %s702_s20 = sphi %s747_s20, %s912_s20   ;;  %s698_s19 = sphi %s745_s19, %s911_s19   ;;  %s694_s18 = sphi %s743_s18, %s910_s18  }
   0x7   : > { %p42_p0 = scmp.ne.s32.totalorder %s698_s19, %s694_s18  ;;  %p43_p1 = scmp.eq.s32.totalorder %s764_s22, 0 }
   0x8   : > { %p150_p2 = scmp.eq.s32.totalorder %s764_s22, 1  ;;  %p156_p3 = scmp.eq.s32.totalorder %s452_s23, 1 }
   0x9   : > { %p773_p4 = por %p43_p1, %p42_p0  ;;  %p453_p5 = scmp.ge.s32.totalorder %s706_s21, 1 }
   0xa   : > { %p778_p6 = por %p156_p3, %p42_p0  ;;  %p163_p7 = scmp.lt.s32.totalorder %s706_s21, 3 }
   0xb   : > { %s175_s28 = sshll.u32 %s899_s1, 4  ;;  %s708_s30 = smov [#allocation5]   ;;  %s176_s28 = int_to_ptr.hbm [resolvable:$true] %s175_s28 }
   0xc   : > { %p786_p8 = pnand %p453_p5, %p163_p7  ;;  %s177_s6 = sshll.u32 %s708_s30, 4  ;;  %s178_s6 = int_to_ptr.vmem [resolvable:$true] %s177_s6 }
   0xd   : > { %s189_s9 = sshll.u32 %s901_s3, 4  ;;  %s709_s10 = smov [#allocation7]   ;;  %s190_s9 = int_to_ptr.hbm [resolvable:$true] %s189_s9 }
   0xe   : > { %p481_p10 = pneg %p786_p8  ;;  %s191_s11 = sshll.u32 %s709_s10, 4  ;;  %s192_s11 = int_to_ptr.vmem [resolvable:$true] %s191_s11 }
   0xf   : > { %s710_s12 = smov 128   ;;  %s711_s13 = smov 8  }
  0x10   : > { %p482_p11 = pnand %p481_p10, %p43_p1  ;;  %s799_s14 = sadd.s32 1, %s706_s21  }
  0x11   : > { %s26_s15 = ssub.s32 %s706_s21, %s799_s14  ;;  %s29_s16 = sadd.s32 1, %s702_s20 }
  0x12   : > { %484 = dma.hbm_to_vmem [thread:$0]  (!%p482_p11), %s176_s28, 16, %s178_s6, [#allocation6]  }
  0x13   : > { %487 = dma.hbm_to_vmem [thread:$0]  (!%p482_p11), %s190_s9, 512, %s192_s11, [#allocation6], %s710_s12, %s710_s12, %s711_s13  }
  0x14   : > { %p27_p12 = scmp.eq.s32.totalorder %s26_s15, 0  ;;  %p36_p13 = scmp.ne.s32.totalorder %s702_s20, %s698_s19 }
  0x15   : > { %p37_p0 = scmp.eq.s32.totalorder %s706_s21, 0  ;;  %p498_p7 = scmp.lt.s32.totalorder %s706_s21, 2 }
  0x16   : > { %s808_s17 = scalar_select %p27_p12, %s702_s20, %s29_s16  }
  0x17   : > { %p38_p3 = por %p37_p0, %p36_p13  ;;  %p812_p5 = por %p150_p2, %p36_p13 }
  0x18   : > { %s208_s26 = sand.u32 1, %s702_s20   ;;  %s458_s28 = sshll.u32 %s706_s21, 3 }
  0x19   : > { %s457_s27 = sshll.u32 %s208_s26, 3  ;;  %s216_s7 = scalar_lea.hbm %s898_s0, %s458_s28 }
  0x1a   : > { %s212_s8 = scalar_lea.vmem [#allocation2], %s457_s27  ;;  %s218_s10 = sshll.u32 %s216_s7, 4  ;;  %s219_s10 = int_to_ptr.hbm [resolvable:$true] %s218_s10 }
  0x1b   : > { %s220_s9 = sshll.u32 %s212_s8, 4  ;;  %p822_p10 = pnand %p498_p7, %p38_p3  ;;  %s221_s9 = int_to_ptr.vmem [resolvable:$true] %s220_s9 }
  0x1c   : > { %s209_s12 = scalar_lea.sflag [#allocation3], %s208_s26  ;;  %s606_s13 = sshra.s32 %s219_s10, 4  ;;  %s607_s13 = int_to_ptr.hbm [resolvable:$true] %s606_s13 }
  0x1d   : > { %s608_s15 = scalar_lea.hbm %s607_s13, 8  ;;  %p610_p11 = pneg %p822_p10 }
  0x1e   : > { %p609_p2 = scmp.ne.s32.totalorder %s607_s13, %s608_s15  ;;  %s613_s28 = scalar_lea.hbm %s898_s0, 16 }
  0x1f   : > { %p614_p0 = scmp.lt.s32.totalorder %s607_s13, %s898_s0  ;;  %p615_p3 = scmp.lt.s32.totalorder %s613_s28, %s608_s15 }
  0x20   : > { %p611_p12 = pnand %p610_p11, %p609_p2 }
  0x21   : > { %p616_p7 = por %p615_p3, %p614_p0 }
  0x22   : > { %p612_p13 = pneg %p611_p12 }
  0x24   : > { %p617_p9 = pnand %p616_p7, %p612_p13 }
  0x26   : > { %620 = shalt.err (!%p617_p9)
}
  0x27   : > { %491 = dma.hbm_to_vmem [thread:$0]  (!%p822_p10), %s219_s10, 128, %s221_s9, %s209_s12  }
  0x28   : > { %229 = sbr.rel (%p786_p8) target bundleno = 450 (0x1c2), region = 40  ;;  %s839_s26 = sand.u32 (!%p786_p8), 1, %s698_s19  }
  0x29   : > { %s460_s7 = sshll.u32 (!%p786_p8), %s839_s26, 3  ;;  %s232_s8 = scalar_lea.sflag (!%p786_p8), [#allocation3], %s839_s26 }
  0x2a   : > { %s235_s13 = scalar_lea.vmem (!%p786_p8), [#allocation2], %s460_s7 }
  0x2d   : > { %681 = dma.done.wait (%p773_p4), %s232_s8, 128  }
  0x2e   : > { %683 = vsyncadd (%p773_p4), %s232_s8, 4294967168 }
  0x2f   : > { %685 = dma.done.wait (%p43_p1), [#allocation6], 528  }
  0x30   : > { %687 = vsyncadd (%p43_p1), [#allocation6], 4294966768  ;;  %vm274_vm0 = vcmask 261120   ;;  %v273_v0 = vld [vmem:[%s235_s13] sm:$0xff]  ;;  %v712_v2 = vmov 32.0   ;;  %v314_v17 = vld [vmem:[#allocation7] sm:$0xff] }
  0x31   : > { %v275_v1 = vsel %vm274_vm0, %v273_v0, 0.0  ;;  %542 = vrcp.f32 %v712_v2  ;;  %v317_v14 = vld [vmem:[#allocation7 + $0x18] sm:$0xff]  ;;  %v316_v15 = vld [vmem:[#allocation7 + $0x10] sm:$0xff]  ;;  %v315_v16 = vld [vmem:[#allocation7 + $0x8] sm:$0xff]  ;;  %s466_s9 = sshll.u32 %s764_s22, 3  ;;  %s272_s27 = scalar_lea.vmem [#allocation8], %s460_s7 }
  0x32   : > { %276 = vadd.xlane.f32.xlu0 %v275_v1  ;;  %337 = vmatpush.msra.mxu0 %v317_v14  ;;  %v539_v27 = vld [vmem:[#allocation5] ss:$0 sm:$0xff]  ;;  %v540_v30 = vld [vmem:[%s900_s2] ss:$0 sm:$0xff]  ;;  %s358_s16 = scalar_lea.hbm %s903_s5, %s466_s9  ;;  %s360_s28 = sshll.u32 %s272_s27, 4  ;;  %s361_s28 = int_to_ptr.vmem [resolvable:$true] %s360_s28 }
  0x33   : > { %v541_v33 = vld [vmem:[%s902_s4] ss:$0 sm:$0xff]  ;;  %s362_s30 = sshll.u32 %s358_s16, 4  ;;  %s348_s22 = scalar_lea.sflag [#allocation4], %s839_s26  ;;  %s363_s30 = int_to_ptr.hbm [resolvable:$true] %s362_s30 }
  0x34   : > { %338 = vmatpush.msra.mxu0 %v316_v15  ;;  %s650_s6 = sshra.s32 %s363_s30, 4  ;;  %s656_s7 = scalar_lea.hbm %s903_s5, 16  ;;  %s651_s6 = int_to_ptr.hbm [resolvable:$true] %s650_s6 }
  0x35   : > { %s652_s8 = scalar_lea.hbm %s651_s6, 8  ;;  %p657_p9 = scmp.lt.s32.totalorder %s651_s6, %s903_s5 }
  0x36   : > { %339 = vmatpush.msra.mxu0 %v315_v16  ;;  %p653_p1 = scmp.ne.s32.totalorder %s651_s6, %s652_s8  ;;  %p658_p10 = scmp.lt.s32.totalorder %s656_s7, %s652_s8 }
  0x37   : > { %v543_v3 = vpop.eup %542 }
  0x38   : > { %v279_v4 = vmul.f32 32.0, %v543_v3  ;;  %vm283_vm1 = vweird.f32 %v543_v3  ;;  %340 = vmatpush.msra.mxu0 %v314_v17  ;;  %p654_p4 = pnand %p653_p1, %p812_p5  ;;  %p659_p2 = por %p658_p10, %p657_p9 }
  0x3a   : > { %v280_v5 = vsub.f32 1.0, %v279_v4  ;;  %p655_p8 = pneg %p654_p4 }
  0x3c   : > { %v281_v6 = vmul.f32 %v543_v3, %v280_v5  ;;  %p660_p11 = pnand %p659_p2, %p655_p8 }
  0x3e   : > { %v282_v7 = vadd.f32 %v543_v3, %v281_v6 }
  0x40   : > { %v284_v8 = vsel %vm283_vm1, %v543_v3, %v282_v7 }
  0xa5   : > { %v277_v9 = vpop.xlane.xlu0 %276 }
  0xa6   : > { %v285_v10 = vmul.f32 %v284_v8, %v277_v9 }
  0xa8   : > { %v286_v11 = vsub.f32 %v273_v0, %v285_v10 }
  0xaa   : > { %v287_v12 = vmul.f32 %v286_v11, %v286_v11 }
  0xac   : > { %v288_v13 = vsel %vm274_vm0, %v287_v12, 0.0 }
  0xad   : > { %289 = vadd.xlane.f32.xlu0 %v288_v13 }
 0x120   : > { %v290_v18 = vpop.xlane.xlu0 %289 }
 0x121   : > { %v291_v19 = vmul.f32 %v290_v18, %v284_v8 }
 0x123   : > { %v292_v20 = vadd.f32 1e-05, %v291_v19 }
 0x125   : > { %544 = vrsqrt.f32 %v292_v20  ;;  %vm299_vm3 = vweird.f32 %v292_v20 }
 0x12b   : > { %v545_v21 = vpop.eup %544 }
 0x12c   : > { %v294_v22 = vmul.f32 %v545_v21, %v292_v20  ;;  %vm300_vm2 = vweird.f32 %v545_v21 }
 0x12d   : > { %vm301_vm4 = vmor %vm299_vm3, %vm300_vm2 }
 0x12e   : > { %v295_v23 = vmul.f32 %v545_v21, %v294_v22 }
 0x130   : > { %v296_v24 = vmul.f32 0.5, %v295_v23 }
 0x132   : > { %v297_v25 = vsub.f32 1.5, %v296_v24 }
 0x134   : > { %v298_v26 = vmul.f32 %v545_v21, %v297_v25 }
 0x136   : > { %v302_v28 = vsel %vm301_vm4, %v545_v21, %v298_v26 }
 0x137   : > { %v303_v29 = vmul.f32 %v302_v28, %v286_v11 }
 0x139   : > { %v308_v31 = vmul.f32 %v539_v27, %v303_v29 }
 0x13b   : > { %v313_v32 = vadd.f32 %v540_v30, %v308_v31 }
 0x13d   : > { %464 = vmatmul.msk.f32.vlgmr.msra.gmra.mxu0 %vm274_vm0, %v313_v32 }
 0x1ba   : > { %v342_v34 = vpop.f32.mrf.mxu0 }
 0x1bb   : > { %v343_v35 = vadd.f32 %v541_v33, %v342_v34 }
 0x1bd   : > { %v345_v36 = vadd.f32 %v343_v35, %v273_v0 }
 0x1bf   : > { %346 = vst.msk [vmem:[%s272_s27] sm:$0xff] %vm274_vm0, %v345_v36 }
 0x1c0   : > { %663 = shalt.err (!%p660_p11)
}
 0x1c1   : > { %479 = dma.vmem_to_hbm [thread:$0]  (%p812_p5), %s361_s28, 128, %s363_s30, %s348_s22  }
 0x1c2 PF: > { %s374_s26 = sand.u32 1, %s694_s18   ;;  %p909_p12 = scmp.ge.s32.totalorder %s706_s21, 2 }
 0x1c3   : > { %s375_s10 = scalar_lea.sflag [#allocation4], %s374_s26 }
 0x1c4   : > { %p493_p13 = pnand %p909_p12, %p778_p6 }
 0x1c6   : > { %p494_p0 = pneg %p493_p13 }
 0x1c8   : > { %689 = dma.done.wait (%p494_p0), %s375_s10, 128  }
 0x1c9   : > { %691 = vsyncadd (%p494_p0), %s375_s10, 4294967168  ;;  %p19_p3 = scmp.ge.s32.totalorder %s799_s14, 4   ;;  %s910_s18 = smov %s698_s19 }
 0x1ca   : > { %s911_s19 = smov %s702_s20  ;;  %s912_s20 = smov %s808_s17 }
 0x1cb   : > { %s913_s21 = smov %s799_s14  ;;  %21 = sbr.rel (!%p19_p3) target bundleno = 6 (0x6), region = 93 }
 0x1d0   :  { %381 = vsyncpa [#allocation3], 1 }
 0x1d1   :  { %383 = vsyncpa [#allocation3 + $0x1], 1 }
 0x1d2   :  { %384 = vsyncpa [#allocation6], 1 }
 0x1d3   :  { %385 = vsyncpa [#allocation4], 1 }
 0x1d4   :  { %387 = vsyncpa [#allocation4 + $0x1], 1 }

</bundles_post_ra>
